<compile_context>
chip_gen: v6e
topology: v6e:2x2x1
jax: 0.10.0
libtpu: 0.0.40
codegen_flags: <defaults>
</compile_context>

<pallas_src>
import functools
import math

import jax
import jax.numpy as jnp
from jax.experimental import pallas as pl
from jax.experimental.pallas import tpu as pltpu


def _gat_model_kernel(x_ref, wg_ref, asrc_bd_ref, adst_bd_ref, mask_ref,
                      pool_ref, wfc_ref, bfc_ref, out_ref,
                      *, heads, hidden, slope):
    # x_ref:       (N, F_in)             node features
    # wg_ref:      (F_in, heads*hidden)  GATConv lin weight (transposed)
    # asrc_bd_ref: (heads*hidden, heads) block-diagonal att_src matrix
    # adst_bd_ref: (heads*hidden, heads) block-diagonal att_dst matrix
    # mask_ref:    (N, N)                additive mask: 0 on edge j->i, -1e30 else
    # pool_ref:    (G, N)                global_mean_pool matrix, pre-divided by heads
    # wfc_ref:     (hidden, out)         fc weight (transposed)
    # bfc_ref:     (1, out)              fc bias with bg @ wfc folded in
    x = x_ref[...]

    # One lane-dense MXU matmul projects all heads at once: (N, heads*hidden).
    xp = jnp.dot(x, wg_ref[...], preferred_element_type=jnp.float32)

    # All-heads attention scores via two MXU matmuls (MXU is otherwise idle).
    e_dst_all = jnp.dot(xp, adst_bd_ref[...],
                        preferred_element_type=jnp.float32)        # (N, heads)
    e_src_all = jnp.dot(xp, asrc_bd_ref[...],
                        preferred_element_type=jnp.float32)        # (N, heads)
    e_src_t = e_src_all.T                                          # (heads, N), hoisted once

    mask_bias = mask_ref[...]                                      # (N, N)

    n = x.shape[0]
    acc = jnp.zeros((n, hidden), dtype=jnp.float32)
    for h in range(heads):  # static unroll; use lax.fori_loop for ~50 heads
        xh = xp[:, h * hidden:(h + 1) * hidden]                    # (N, hidden)

        # logits[i, j] = a_dst.Wh_i + a_src.Wh_j  (edge j -> i), LeakyReLU(0.2),
        # then additive mask (-1e30 overwrites non-edges -> exp underflows to 0).
        logits = e_dst_all[:, h:h + 1] + e_src_t[h:h + 1, :]        # (N, N)
        logits = jnp.where(logits >= 0, logits, slope * logits)     # LeakyReLU
        logits = logits + mask_bias

        # Masked softmax over source nodes j (self-loop guarantees >=1 entry).
        m = jnp.max(logits, axis=-1, keepdims=True)
        p = jnp.exp(logits - m)
        denom = jnp.sum(p, axis=-1, keepdims=True)
        alpha = p * pl.reciprocal(denom, approx=True)               # EUP slot

        # Aggregate messages for this head and accumulate the head sum.
        acc = acc + jnp.dot(alpha, xh, preferred_element_type=jnp.float32)

    # 1/heads and GATConv bias are folded into pool_ref / bfc_ref on the host.
    pooled = jnp.dot(pool_ref[...], acc, preferred_element_type=jnp.float32)
    out = jnp.dot(pooled, wfc_ref[...],
                  preferred_element_type=jnp.float32) + bfc_ref[...]
    out_ref[...] = out.astype(out_ref.dtype)


def gat_forward(x, adj, pool, params, *, slope=0.2):
    """Fused GATModel forward: GATConv (multi-head, concat=False) -> mean pool -> fc."""
    wg, asrc, adst, bg, wfc, bfc = params
    heads, hidden = asrc.shape
    num_graphs = pool.shape[0]
    out_dim = wfc.shape[1]

    # Host-side (constant-foldable) precomputation:
    #   block-diagonal attention matrices, additive mask bias, folded epilogue.
    eye = jnp.eye(heads, dtype=jnp.float32)
    asrc_bd = (asrc[:, :, None] * eye[:, None, :]).reshape(heads * hidden, heads)
    adst_bd = (adst[:, :, None] * eye[:, None, :]).reshape(heads * hidden, heads)
    mask_bias = jnp.where(adj > 0.5, 0.0, -1e30).astype(jnp.float32)
    pool_scaled = (pool * jnp.float32(1.0 / heads)).astype(jnp.float32)
    bfc_folded = (bfc + jnp.dot(bg, wfc)).astype(jnp.float32)

    kernel = functools.partial(_gat_model_kernel, heads=heads, hidden=hidden,
                               slope=slope)
    vmem = pltpu.MemorySpace.VMEM
    return pl.pallas_call(
        kernel,
        out_shape=jax.ShapeDtypeStruct((num_graphs, out_dim), jnp.float32),
        in_specs=[pl.BlockSpec(memory_space=vmem) for _ in range(8)],
        out_specs=pl.BlockSpec(memory_space=vmem),
    )(x, wg, asrc_bd, adst_bd, mask_bias, pool_scaled, wfc, bfc_folded)


def init_gat_params(key, input_dim, hidden_dim, output_dim, heads):
    """Deterministic init: glorot for GAT weights, PyTorch Linear-style for fc."""
    k1, k2, k3, k4, k5 = jax.random.split(key, 5)
    # GATConv lin weight (glorot_uniform), stored transposed [F_in, heads*hidden].
    a = math.sqrt(6.0 / (input_dim + heads * hidden_dim))
    wg = jax.random.uniform(k1, (input_dim, heads * hidden_dim), jnp.float32, -a, a)
    a_att = math.sqrt(6.0 / (1 + heads * hidden_dim))
    att_src = jax.random.uniform(k2, (heads, hidden_dim), jnp.float32, -a_att, a_att)
    att_dst = jax.random.uniform(k3, (heads, hidden_dim), jnp.float32, -a_att, a_att)
    b_gat = jnp.zeros((1, hidden_dim), jnp.float32)  # GATConv bias init: zeros
    # fc: nn.Linear default (kaiming_uniform(a=sqrt(5)) -> U(-1/sqrt(fan_in), ...)).
    bound = 1.0 / math.sqrt(hidden_dim)
    wfc = jax.random.uniform(k4, (hidden_dim, output_dim), jnp.float32, -bound, bound)
    bfc = jax.random.uniform(k5, (1, output_dim), jnp.float32, -bound, bound)
    return wg, att_src, att_dst, b_gat, wfc, bfc


def gat_reference(x, adj, pool, params, *, slope=0.2):
    """Pure-JAX reference (highest matmul precision) for correctness checking."""
    wg, asrc, adst, bg, wfc, bfc = params
    heads, hidden = asrc.shape
    hi = jax.lax.Precision.HIGHEST
    xp = jnp.dot(x, wg, precision=hi)
    edge_mask = adj > 0.5
    acc = jnp.zeros((x.shape[0], hidden), jnp.float32)
    for h in range(heads):
        xh = xp[:, h * hidden:(h + 1) * hidden]
        e_dst = jnp.sum(xh * adst[h], axis=-1, keepdims=True)
        e_src = jnp.sum(xh * asrc[h], axis=-1, keepdims=True).T
        logits = e_dst + e_src
        logits = jnp.where(logits >= 0, logits, slope * logits)
        logits = jnp.where(edge_mask, logits, -1e30)
        alpha = jax.nn.softmax(logits, axis=-1)
        acc = acc + jnp.dot(alpha, xh, precision=hi)
    node = acc / heads + bg
    pooled = jnp.dot(pool, node, precision=hi)
    return jnp.dot(pooled, wfc, precision=hi) + bfc


if __name__ == "__main__":
    key = jax.random.PRNGKey(0)

    # Small GAT graph batch: 16 nodes split into 2 graphs of 8 nodes each.
    # input_dim=16, hidden_dim=32, output_dim=8, num_heads=4
    # (heads*hidden = 128 -> lane-dense projection; the module default of 50
    #  heads also works but should use a fori_loop over heads).
    num_nodes, num_graphs = 16, 2
    input_dim, hidden_dim, output_dim, num_heads = 16, 32, 8, 4

    kx, ka, kp = jax.random.split(key, 3)
    x = jax.random.normal(kx, (num_nodes, input_dim), jnp.float32)

    # Batch assignment: first 8 nodes -> graph 0, last 8 -> graph 1.
    batch = jnp.concatenate([jnp.zeros(8, jnp.int32), jnp.ones(8, jnp.int32)])

    # Deterministic intra-graph random edges as a dense mask, adj[i, j] = 1 iff
    # edge j -> i, plus self loops (GATConv default add_self_loops=True).
    same_graph = batch[:, None] == batch[None, :]
    rand_edges = jax.random.bernoulli(ka, 0.3, (num_nodes, num_nodes))
    adj = jnp.where(rand_edges & same_graph, 1.0, 0.0).astype(jnp.float32)
    adj = jnp.maximum(adj, jnp.eye(num_nodes, dtype=jnp.float32))

    # global_mean_pool as an averaging matrix [num_graphs, num_nodes].
    onehot = (batch[None, :] == jnp.arange(num_graphs)[:, None]).astype(jnp.float32)
    pool = onehot / onehot.sum(axis=1, keepdims=True)

    params = init_gat_params(kp, input_dim, hidden_dim, output_dim, num_heads)

    out = gat_forward(x, adj, pool, params, slope=0.2)
    out = jax.block_until_ready(out)

    ref = gat_reference(x, adj, pool, params, slope=0.2)
    assert out.shape == (num_graphs, output_dim)
    assert jnp.allclose(out, ref, atol=1e-3, rtol=1e-3), "mismatch vs reference"

    print("KERNEL_OK")
</pallas_src>

<mosaic_0001>
module attributes {stable_mosaic.version = 11 : i64} {
  func.func @_gat_model_kernel(%arg0: memref<16x16xf32, #tpu.memory_space<vmem>>, %arg1: memref<16x128xf32, #tpu.memory_space<vmem>>, %arg2: memref<128x4xf32, #tpu.memory_space<vmem>>, %arg3: memref<128x4xf32, #tpu.memory_space<vmem>>, %arg4: memref<16x16xf32, #tpu.memory_space<vmem>>, %arg5: memref<2x16xf32, #tpu.memory_space<vmem>>, %arg6: memref<32x8xf32, #tpu.memory_space<vmem>>, %arg7: memref<1x8xf32, #tpu.memory_space<vmem>>, %arg8: memref<2x8xf32, #tpu.memory_space<vmem>>) attributes {dimension_semantics = [], scalar_prefetch = 0 : i64, scratch_operands = 0 : i64, tpu.core_type = #tpu.core_type<tc>} {
    %c0 = arith.constant 0 : index
    %c0_0 = arith.constant 0 : index
    %0 = vector.load %arg0[%c0, %c0_0] : memref<16x16xf32, #tpu.memory_space<vmem>>, vector<16x16xf32>
    %c0_1 = arith.constant 0 : index
    %c0_2 = arith.constant 0 : index
    %1 = vector.load %arg1[%c0_1, %c0_2] : memref<16x128xf32, #tpu.memory_space<vmem>>, vector<16x128xf32>
    %cst = arith.constant dense<0.000000e+00> : vector<16x128xf32>
    %2 = tpu.matmul %0, %1, %cst {dimension_numbers = #tpu.dot_dimension_numbers<[1], [0], [0], [1], [0, 0, 1, 1], [], []>} : vector<16x16xf32>, vector<16x128xf32>, vector<16x128xf32> -> vector<16x128xf32>
    %c0_3 = arith.constant 0 : index
    %c0_4 = arith.constant 0 : index
    %3 = vector.load %arg3[%c0_3, %c0_4] : memref<128x4xf32, #tpu.memory_space<vmem>>, vector<128x4xf32>
    %cst_5 = arith.constant dense<0.000000e+00> : vector<16x4xf32>
    %4 = tpu.matmul %2, %3, %cst_5 {dimension_numbers = #tpu.dot_dimension_numbers<[1], [0], [0], [1], [0, 0, 1, 1], [], []>} : vector<16x128xf32>, vector<128x4xf32>, vector<16x4xf32> -> vector<16x4xf32>
    %c0_6 = arith.constant 0 : index
    %c0_7 = arith.constant 0 : index
    %5 = vector.load %arg2[%c0_6, %c0_7] : memref<128x4xf32, #tpu.memory_space<vmem>>, vector<128x4xf32>
    %cst_8 = arith.constant dense<0.000000e+00> : vector<16x4xf32>
    %6 = tpu.matmul %2, %5, %cst_8 {dimension_numbers = #tpu.dot_dimension_numbers<[1], [0], [0], [1], [0, 0, 1, 1], [], []>} : vector<16x128xf32>, vector<128x4xf32>, vector<16x4xf32> -> vector<16x4xf32>
    %7 = tpu.transpose %6, [1, 0] : vector<16x4xf32> -> vector<4x16xf32>
    %c0_9 = arith.constant 0 : index
    %c0_10 = arith.constant 0 : index
    %8 = vector.load %arg4[%c0_9, %c0_10] : memref<16x16xf32, #tpu.memory_space<vmem>>, vector<16x16xf32>
    %cst_11 = arith.constant 0.000000e+00 : f32
    %9 = vector.broadcast %cst_11 : f32 to vector<16x32xf32>
    %10 = vector.extract_strided_slice %2 {offsets = [0, 0], sizes = [16, 32], strides = [1, 1]} : vector<16x128xf32> to vector<16x32xf32>
    %11 = vector.extract_strided_slice %4 {offsets = [0, 0], sizes = [16, 1], strides = [1, 1]} : vector<16x4xf32> to vector<16x1xf32>
    %12 = vector.extract_strided_slice %7 {offsets = [0, 0], sizes = [1, 16], strides = [1, 1]} : vector<4x16xf32> to vector<1x16xf32>
    %13 = vector.broadcast %11 : vector<16x1xf32> to vector<16x16xf32>
    %14 = vector.broadcast %12 : vector<1x16xf32> to vector<16x16xf32>
    %15 = arith.addf %13, %14 : vector<16x16xf32>
    %cst_12 = arith.constant 0.000000e+00 : f32
    %16 = vector.broadcast %cst_12 : f32 to vector<16x16xf32>
    %17 = arith.cmpf oge, %15, %16 : vector<16x16xf32>
    %cst_13 = arith.constant 2.000000e-01 : f32
    %18 = vector.broadcast %cst_13 : f32 to vector<16x16xf32>
    %19 = arith.mulf %18, %15 : vector<16x16xf32>
    %20 = arith.select %17, %15, %19 : vector<16x16xi1>, vector<16x16xf32>
    %21 = arith.addf %20, %8 : vector<16x16xf32>
    %cst_14 = arith.constant dense<0xFF800000> : vector<16xf32>
    %22 = vector.multi_reduction <maximumf>, %21, %cst_14 [1] : vector<16x16xf32> to vector<16xf32>
    %23 = vector.shape_cast %22 : vector<16xf32> to vector<16x1xf32>
    %24 = vector.broadcast %23 : vector<16x1xf32> to vector<16x16xf32>
    %25 = arith.subf %21, %24 : vector<16x16xf32>
    %26 = math.exp %25 : vector<16x16xf32>
    %cst_15 = arith.constant dense<0.000000e+00> : vector<16xf32>
    %27 = vector.multi_reduction <add>, %26, %cst_15 [1] : vector<16x16xf32> to vector<16xf32>
    %28 = vector.shape_cast %27 : vector<16xf32> to vector<16x1xf32>
    %29 = tpu.reciprocal %28 {approx = true} : vector<16x1xf32> -> vector<16x1xf32>
    %30 = vector.broadcast %29 : vector<16x1xf32> to vector<16x16xf32>
    %31 = arith.mulf %26, %30 : vector<16x16xf32>
    %cst_16 = arith.constant dense<0.000000e+00> : vector<16x32xf32>
    %32 = tpu.matmul %31, %10, %cst_16 {dimension_numbers = #tpu.dot_dimension_numbers<[1], [0], [0], [1], [0, 0, 1, 1], [], []>} : vector<16x16xf32>, vector<16x32xf32>, vector<16x32xf32> -> vector<16x32xf32>
    %33 = arith.addf %9, %32 : vector<16x32xf32>
    %34 = vector.extract_strided_slice %2 {offsets = [0, 32], sizes = [16, 32], strides = [1, 1]} : vector<16x128xf32> to vector<16x32xf32>
    %35 = vector.extract_strided_slice %4 {offsets = [0, 1], sizes = [16, 1], strides = [1, 1]} : vector<16x4xf32> to vector<16x1xf32>
    %36 = vector.extract_strided_slice %7 {offsets = [1, 0], sizes = [1, 16], strides = [1, 1]} : vector<4x16xf32> to vector<1x16xf32>
    %37 = vector.broadcast %35 : vector<16x1xf32> to vector<16x16xf32>
    %38 = vector.broadcast %36 : vector<1x16xf32> to vector<16x16xf32>
    %39 = arith.addf %37, %38 : vector<16x16xf32>
    %cst_17 = arith.constant 0.000000e+00 : f32
    %40 = vector.broadcast %cst_17 : f32 to vector<16x16xf32>
    %41 = arith.cmpf oge, %39, %40 : vector<16x16xf32>
    %cst_18 = arith.constant 2.000000e-01 : f32
    %42 = vector.broadcast %cst_18 : f32 to vector<16x16xf32>
    %43 = arith.mulf %42, %39 : vector<16x16xf32>
    %44 = arith.select %41, %39, %43 : vector<16x16xi1>, vector<16x16xf32>
    %45 = arith.addf %44, %8 : vector<16x16xf32>
    %cst_19 = arith.constant dense<0xFF800000> : vector<16xf32>
    %46 = vector.multi_reduction <maximumf>, %45, %cst_19 [1] : vector<16x16xf32> to vector<16xf32>
    %47 = vector.shape_cast %46 : vector<16xf32> to vector<16x1xf32>
    %48 = vector.broadcast %47 : vector<16x1xf32> to vector<16x16xf32>
    %49 = arith.subf %45, %48 : vector<16x16xf32>
    %50 = math.exp %49 : vector<16x16xf32>
    %cst_20 = arith.constant dense<0.000000e+00> : vector<16xf32>
    %51 = vector.multi_reduction <add>, %50, %cst_20 [1] : vector<16x16xf32> to vector<16xf32>
    %52 = vector.shape_cast %51 : vector<16xf32> to vector<16x1xf32>
    %53 = tpu.reciprocal %52 {approx = true} : vector<16x1xf32> -> vector<16x1xf32>
    %54 = vector.broadcast %53 : vector<16x1xf32> to vector<16x16xf32>
    %55 = arith.mulf %50, %54 : vector<16x16xf32>
    %cst_21 = arith.constant dense<0.000000e+00> : vector<16x32xf32>
    %56 = tpu.matmul %55, %34, %cst_21 {dimension_numbers = #tpu.dot_dimension_numbers<[1], [0], [0], [1], [0, 0, 1, 1], [], []>} : vector<16x16xf32>, vector<16x32xf32>, vector<16x32xf32> -> vector<16x32xf32>
    %57 = arith.addf %33, %56 : vector<16x32xf32>
    %58 = vector.extract_strided_slice %2 {offsets = [0, 64], sizes = [16, 32], strides = [1, 1]} : vector<16x128xf32> to vector<16x32xf32>
    %59 = vector.extract_strided_slice %4 {offsets = [0, 2], sizes = [16, 1], strides = [1, 1]} : vector<16x4xf32> to vector<16x1xf32>
    %60 = vector.extract_strided_slice %7 {offsets = [2, 0], sizes = [1, 16], strides = [1, 1]} : vector<4x16xf32> to vector<1x16xf32>
    %61 = vector.broadcast %59 : vector<16x1xf32> to vector<16x16xf32>
    %62 = vector.broadcast %60 : vector<1x16xf32> to vector<16x16xf32>
    %63 = arith.addf %61, %62 : vector<16x16xf32>
    %cst_22 = arith.constant 0.000000e+00 : f32
    %64 = vector.broadcast %cst_22 : f32 to vector<16x16xf32>
    %65 = arith.cmpf oge, %63, %64 : vector<16x16xf32>
    %cst_23 = arith.constant 2.000000e-01 : f32
    %66 = vector.broadcast %cst_23 : f32 to vector<16x16xf32>
    %67 = arith.mulf %66, %63 : vector<16x16xf32>
    %68 = arith.select %65, %63, %67 : vector<16x16xi1>, vector<16x16xf32>
    %69 = arith.addf %68, %8 : vector<16x16xf32>
    %cst_24 = arith.constant dense<0xFF800000> : vector<16xf32>
    %70 = vector.multi_reduction <maximumf>, %69, %cst_24 [1] : vector<16x16xf32> to vector<16xf32>
    %71 = vector.shape_cast %70 : vector<16xf32> to vector<16x1xf32>
    %72 = vector.broadcast %71 : vector<16x1xf32> to vector<16x16xf32>
    %73 = arith.subf %69, %72 : vector<16x16xf32>
    %74 = math.exp %73 : vector<16x16xf32>
    %cst_25 = arith.constant dense<0.000000e+00> : vector<16xf32>
    %75 = vector.multi_reduction <add>, %74, %cst_25 [1] : vector<16x16xf32> to vector<16xf32>
    %76 = vector.shape_cast %75 : vector<16xf32> to vector<16x1xf32>
    %77 = tpu.reciprocal %76 {approx = true} : vector<16x1xf32> -> vector<16x1xf32>
    %78 = vector.broadcast %77 : vector<16x1xf32> to vector<16x16xf32>
    %79 = arith.mulf %74, %78 : vector<16x16xf32>
    %cst_26 = arith.constant dense<0.000000e+00> : vector<16x32xf32>
    %80 = tpu.matmul %79, %58, %cst_26 {dimension_numbers = #tpu.dot_dimension_numbers<[1], [0], [0], [1], [0, 0, 1, 1], [], []>} : vector<16x16xf32>, vector<16x32xf32>, vector<16x32xf32> -> vector<16x32xf32>
    %81 = arith.addf %57, %80 : vector<16x32xf32>
    %82 = vector.extract_strided_slice %2 {offsets = [0, 96], sizes = [16, 32], strides = [1, 1]} : vector<16x128xf32> to vector<16x32xf32>
    %83 = vector.extract_strided_slice %4 {offsets = [0, 3], sizes = [16, 1], strides = [1, 1]} : vector<16x4xf32> to vector<16x1xf32>
    %84 = vector.extract_strided_slice %7 {offsets = [3, 0], sizes = [1, 16], strides = [1, 1]} : vector<4x16xf32> to vector<1x16xf32>
    %85 = vector.broadcast %83 : vector<16x1xf32> to vector<16x16xf32>
    %86 = vector.broadcast %84 : vector<1x16xf32> to vector<16x16xf32>
    %87 = arith.addf %85, %86 : vector<16x16xf32>
    %cst_27 = arith.constant 0.000000e+00 : f32
    %88 = vector.broadcast %cst_27 : f32 to vector<16x16xf32>
    %89 = arith.cmpf oge, %87, %88 : vector<16x16xf32>
    %cst_28 = arith.constant 2.000000e-01 : f32
    %90 = vector.broadcast %cst_28 : f32 to vector<16x16xf32>
    %91 = arith.mulf %90, %87 : vector<16x16xf32>
    %92 = arith.select %89, %87, %91 : vector<16x16xi1>, vector<16x16xf32>
    %93 = arith.addf %92, %8 : vector<16x16xf32>
    %cst_29 = arith.constant dense<0xFF800000> : vector<16xf32>
    %94 = vector.multi_reduction <maximumf>, %93, %cst_29 [1] : vector<16x16xf32> to vector<16xf32>
    %95 = vector.shape_cast %94 : vector<16xf32> to vector<16x1xf32>
    %96 = vector.broadcast %95 : vector<16x1xf32> to vector<16x16xf32>
    %97 = arith.subf %93, %96 : vector<16x16xf32>
    %98 = math.exp %97 : vector<16x16xf32>
    %cst_30 = arith.constant dense<0.000000e+00> : vector<16xf32>
    %99 = vector.multi_reduction <add>, %98, %cst_30 [1] : vector<16x16xf32> to vector<16xf32>
    %100 = vector.shape_cast %99 : vector<16xf32> to vector<16x1xf32>
    %101 = tpu.reciprocal %100 {approx = true} : vector<16x1xf32> -> vector<16x1xf32>
    %102 = vector.broadcast %101 : vector<16x1xf32> to vector<16x16xf32>
    %103 = arith.mulf %98, %102 : vector<16x16xf32>
    %cst_31 = arith.constant dense<0.000000e+00> : vector<16x32xf32>
    %104 = tpu.matmul %103, %82, %cst_31 {dimension_numbers = #tpu.dot_dimension_numbers<[1], [0], [0], [1], [0, 0, 1, 1], [], []>} : vector<16x16xf32>, vector<16x32xf32>, vector<16x32xf32> -> vector<16x32xf32>
    %105 = arith.addf %81, %104 : vector<16x32xf32>
    %c0_32 = arith.constant 0 : index
    %c0_33 = arith.constant 0 : index
    %106 = vector.load %arg5[%c0_32, %c0_33] : memref<2x16xf32, #tpu.memory_space<vmem>>, vector<2x16xf32>
    %cst_34 = arith.constant dense<0.000000e+00> : vector<2x32xf32>
    %107 = tpu.matmul %106, %105, %cst_34 {dimension_numbers = #tpu.dot_dimension_numbers<[1], [0], [0], [1], [0, 0, 1, 1], [], []>} : vector<2x16xf32>, vector<16x32xf32>, vector<2x32xf32> -> vector<2x32xf32>
    %c0_35 = arith.constant 0 : index
    %c0_36 = arith.constant 0 : index
    %108 = vector.load %arg6[%c0_35, %c0_36] : memref<32x8xf32, #tpu.memory_space<vmem>>, vector<32x8xf32>
    %cst_37 = arith.constant dense<0.000000e+00> : vector<2x8xf32>
    %109 = tpu.matmul %107, %108, %cst_37 {dimension_numbers = #tpu.dot_dimension_numbers<[1], [0], [0], [1], [0, 0, 1, 1], [], []>} : vector<2x32xf32>, vector<32x8xf32>, vector<2x8xf32> -> vector<2x8xf32>
    %c0_38 = arith.constant 0 : index
    %c0_39 = arith.constant 0 : index
    %110 = vector.load %arg7[%c0_38, %c0_39] : memref<1x8xf32, #tpu.memory_space<vmem>>, vector<1x8xf32>
    %111 = vector.broadcast %110 : vector<1x8xf32> to vector<2x8xf32>
    %112 = arith.addf %109, %111 : vector<2x8xf32>
    %c0_40 = arith.constant 0 : index
    %c0_41 = arith.constant 0 : index
    %113 = vector.load %arg8[%c0_40, %c0_41] : memref<2x8xf32, #tpu.memory_space<vmem>>, vector<2x8xf32>
    tpu.vector_store %arg8[%c0_40, %c0_41], %112 {strides = array<i32>} : memref<2x8xf32, #tpu.memory_space<vmem>>, vector<2x8xf32>,
    return
  }
}

</mosaic_0001>

<bundles_post_ra>
// kernel: tpu_custom_call.1
= control target key start
LH: loop header
LB: loop body
LE: loop exit
PB: predicated region body
PF: predicated region fallthrough
CT: control target
= control target key end

     0   :  { %vm34_vm0 = vcmask 130048   ;;  %s1563_s0 = inlined_call_operand.vmem [shape: f32[16,16], index: 0, kind: input, shape index: {}]   ;;  %s1564_s1 = inlined_call_operand.vmem [shape: f32[16,128], index: 1, kind: input, shape index: {}]   ;;  %s1565_s2 = inlined_call_operand.vmem [shape: f32[128,4], index: 2, kind: input, shape index: {}]   ;;  %s1566_s3 = inlined_call_operand.vmem [shape: f32[128,4], index: 3, kind: input, shape index: {}]   ;;  %s1567_s4 = inlined_call_operand.vmem [shape: f32[16,16], index: 4, kind: input, shape index: {}]   ;;  %s1568_s5 = inlined_call_operand.vmem [shape: f32[2,16], index: 5, kind: input, shape index: {}]   ;;  %s1569_s6 = inlined_call_operand.vmem [shape: f32[32,8], index: 6, kind: input, shape index: {}]   ;;  %s1570_s7 = inlined_call_operand.vmem [shape: f32[1,8], index: 7, kind: input, shape index: {}]   ;;  %s1571_s8 = inlined_call_operand.hbm [shape: f32[2,8], index: 8, kind: output, shape index: {}]  }
   0x1   :  { %v33_v0 = vld [vmem:[%s1564_s1 + $0x8] sm:$0xff]  ;;  %v32_v1 = vld [vmem:[%s1564_s1] sm:$0xff]  ;;  %v222_v3 = vld [vmem:[%s1565_s2 + $0x78] sm:$0xff] }
   0x2   :  { %v30_v2 = vld [vmem:[%s1563_s0] sm:$0xff]  ;;  %1110 = vmatprep.subr.mxu1 %v33_v0  ;;  %v221_v4 = vld [vmem:[%s1565_s2 + $0x70] sm:$0xff]  ;;  %v31_v5 = vld [vmem:[%s1563_s0 + $0x8] sm:$0xff]  ;;  %1152 = vmatprep.subr.mxu0 %v222_v3 }
   0x3   :  { %1114 = vmatprep.mubr.msk.f32.mxu1 %vm34_vm0, %v30_v2  ;;  %1111 = vmatpush3.msra.mxu1 %v33_v0  ;;  %v131_v6 = vld [vmem:[%s1566_s3 + $0x78] sm:$0xff]  ;;  %v220_v7 = vld [vmem:[%s1565_s2 + $0x68] sm:$0xff]  ;;  %v130_v8 = vld [vmem:[%s1566_s3 + $0x70] sm:$0xff] }
   0x4   :  { %1112 = vmatprep.subr.mxu1 %v32_v1  ;;  %1153 = vmatpush3.msra.mxu0 %v222_v3  ;;  %v219_v9 = vld [vmem:[%s1565_s2 + $0x60] sm:$0xff]  ;;  %v129_v10 = vld [vmem:[%s1566_s3 + $0x68] sm:$0xff]  ;;  %v218_v11 = vld [vmem:[%s1565_s2 + $0x58] sm:$0xff] }
   0x5   :  { %1113 = vmatpush3.msra.mxu1 %v32_v1  ;;  %1154 = vmatprep.subr.mxu0 %v221_v4  ;;  %v128_v12 = vld [vmem:[%s1566_s3 + $0x60] sm:$0xff]  ;;  %v217_v13 = vld [vmem:[%s1565_s2 + $0x50] sm:$0xff]  ;;  %v127_v14 = vld [vmem:[%s1566_s3 + $0x58] sm:$0xff] }
   0x6   :  { %1115 = vmatmul.mubr.msk.f32.vlgmr.msra.gmra.mxu1 %vm34_vm0, %v31_v5  ;;  %1117 = vmatprep.subr.mxu1 %v131_v6 }
   0x7   :  { %1155 = vmatpush3.msra.mxu0 %v221_v4  ;;  %1118 = vmatpush3.msra.mxu1 %v131_v6 }
   0x8   :  { %1156 = vmatprep.subr.mxu0 %v220_v7  ;;  %1119 = vmatprep.subr.mxu1 %v130_v8 }
   0x9   :  { %1157 = vmatpush3.msra.mxu0 %v220_v7  ;;  %1120 = vmatpush3.msra.mxu1 %v130_v8 }
   0xa   :  { %1158 = vmatprep.subr.mxu0 %v219_v9  ;;  %1121 = vmatprep.subr.mxu1 %v129_v10 }
   0xb   :  { %1159 = vmatpush3.msra.mxu0 %v219_v9  ;;  %1122 = vmatpush3.msra.mxu1 %v129_v10 }
   0xc   :  { %1160 = vmatprep.subr.mxu0 %v218_v11  ;;  %1123 = vmatprep.subr.mxu1 %v128_v12 }
   0xd   :  { %13 = vsyncpa [#allocation3], 0  ;;  %1161 = vmatpush3.msra.mxu0 %v218_v11  ;;  %1124 = vmatpush3.msra.mxu1 %v128_v12  ;;  %v216_v15 = vld [vmem:[%s1565_s2 + $0x48] sm:$0xff]  ;;  %v126_v16 = vld [vmem:[%s1566_s3 + $0x50] sm:$0xff]  ;;  %v1304_v36 = vmov 1   ;;  %v1305_v37 = vmov 0   ;;  %v342_v48 = vlaneseq }
   0xe   :  { %1162 = vmatprep.subr.mxu0 %v217_v13  ;;  %1125 = vmatprep.subr.mxu1 %v127_v14  ;;  %v215_v17 = vld [vmem:[%s1565_s2 + $0x40] sm:$0xff]  ;;  %v125_v18 = vld [vmem:[%s1566_s3 + $0x48] sm:$0xff]  ;;  %v214_v19 = vld [vmem:[%s1565_s2 + $0x38] sm:$0xff]  ;;  %v1306_v42 = vmov 2   ;;  %v1307_v43 = vmov 3   ;;  %s1309_s29 = smov 64  }
   0xf   :  { %1163 = vmatpush3.msra.mxu0 %v217_v13  ;;  %1126 = vmatpush3.msra.mxu1 %v127_v14  ;;  %v124_v20 = vld [vmem:[%s1566_s3 + $0x40] sm:$0xff]  ;;  %v213_v21 = vld [vmem:[%s1565_s2 + $0x30] sm:$0xff]  ;;  %v123_v22 = vld [vmem:[%s1566_s3 + $0x38] sm:$0xff]  ;;  %v343_v50 = vshrl.u32 %v342_v48, 7  ;;  %s1310_s30 = smov 32   ;;  %vm1312_vm9 = vmmov 0  }
  0x10   :  { %1164 = vmatprep.subr.mxu0 %v216_v15  ;;  %1127 = vmatprep.subr.mxu1 %v126_v16  ;;  %v212_v23 = vld [vmem:[%s1565_s2 + $0x28] sm:$0xff]  ;;  %v122_v24 = vld [vmem:[%s1566_s3 + $0x30] sm:$0xff]  ;;  %v211_v25 = vld [vmem:[%s1565_s2 + $0x20] sm:$0xff]  ;;  %vm943_vm10 = vcmask 261120   ;;  %s1313_s20 = smov [#allocation2]   ;;  %vm1017_vm11 = vcmask 58368  }
  0x11   :  { %1165 = vmatpush3.msra.mxu0 %v216_v15  ;;  %1128 = vmatpush3.msra.mxu1 %v126_v16  ;;  %v121_v26 = vld [vmem:[%s1566_s3 + $0x28] sm:$0xff]  ;;  %v210_v27 = vld [vmem:[%s1565_s2 + $0x18] sm:$0xff]  ;;  %v120_v28 = vld [vmem:[%s1566_s3 + $0x20] sm:$0xff]  ;;  %v344_v53 = vsub.s32 0, %v343_v50  ;;  %v388_v54 = vsub.s32 1, %v343_v50  ;;  %v602_v55 = vsub.s32 2, %v343_v50 }
  0x12   :  { %1166 = vmatprep.subr.mxu0 %v215_v17  ;;  %1129 = vmatprep.subr.mxu1 %v125_v18  ;;  %v209_v29 = vld [vmem:[%s1565_s2 + $0x10] sm:$0xff]  ;;  %v119_v30 = vld [vmem:[%s1566_s3 + $0x18] sm:$0xff]  ;;  %v208_v31 = vld [vmem:[%s1565_s2 + $0x8] sm:$0xff]  ;;  %v735_v4 = vsub.s32 3, %v343_v50  ;;  %s1025_s21 = sshll.u32 %s1313_s20, 4  ;;  %s1026_s21 = int_to_ptr.vmem [resolvable:$true] %s1025_s21 }
  0x13   :  { %1167 = vmatpush3.msra.mxu0 %v215_v17  ;;  %1130 = vmatpush3.msra.mxu1 %v125_v18  ;;  %v118_v32 = vld [vmem:[%s1566_s3 + $0x10] sm:$0xff]  ;;  %v207_v33 = vld [vmem:[%s1565_s2] sm:$0xff]  ;;  %v117_v34 = vld [vmem:[%s1566_s3 + $0x8] sm:$0xff]  ;;  %p1287_p1 = scmp.lt.s32.totalorder %s1026_s21, %s1026_s21 }
  0x14   :  { %1168 = vmatprep.subr.mxu0 %v214_v19  ;;  %1131 = vmatprep.subr.mxu1 %v124_v20  ;;  %v116_v35 = vld [vmem:[%s1566_s3] sm:$0xff]  ;;  %v331_v1 = vld [vmem:[%s1567_s4 + $0x8] sm:$0xff] }
  0x15   :  { %1169 = vmatpush3.msra.mxu0 %v214_v19  ;;  %1132 = vmatpush3.msra.mxu1 %v124_v20  ;;  %v330_v19 = vld [vmem:[%s1567_s4] sm:$0xff]  ;;  %s1308_s4 = smov 96  }
  0x16   :  { %1170 = vmatprep.subr.mxu0 %v213_v21  ;;  %1133 = vmatprep.subr.mxu1 %v123_v22 }
  0x17   :  { %1171 = vmatpush3.msra.mxu0 %v213_v21  ;;  %1134 = vmatpush3.msra.mxu1 %v123_v22 }
  0x18   :  { %1172 = vmatprep.subr.mxu0 %v212_v23  ;;  %1135 = vmatprep.subr.mxu1 %v122_v24 }
  0x19   :  { %1173 = vmatpush3.msra.mxu0 %v212_v23  ;;  %1136 = vmatpush3.msra.mxu1 %v122_v24 }
  0x1a   :  { %1174 = vmatprep.subr.mxu0 %v211_v25  ;;  %1137 = vmatprep.subr.mxu1 %v121_v26 }
  0x1b   :  { %1175 = vmatpush3.msra.mxu0 %v211_v25  ;;  %1138 = vmatpush3.msra.mxu1 %v121_v26 }
  0x1c   :  { %1176 = vmatprep.subr.mxu0 %v210_v27  ;;  %1139 = vmatprep.subr.mxu1 %v120_v28 }
  0x1d   :  { %1177 = vmatpush3.msra.mxu0 %v210_v27  ;;  %1140 = vmatpush3.msra.mxu1 %v120_v28 }
  0x1e   :  { %1178 = vmatprep.subr.mxu0 %v209_v29  ;;  %1141 = vmatprep.subr.mxu1 %v119_v30 }
  0x1f   :  { %1179 = vmatpush3.msra.mxu0 %v209_v29  ;;  %1142 = vmatpush3.msra.mxu1 %v119_v30 }
  0x20   :  { %1180 = vmatprep.subr.mxu0 %v208_v31  ;;  %1143 = vmatprep.subr.mxu1 %v118_v32 }
  0x21   :  { %1181 = vmatpush3.msra.mxu0 %v208_v31  ;;  %1144 = vmatpush3.msra.mxu1 %v118_v32 }
  0x22   :  { %1182 = vmatprep.subr.mxu0 %v207_v33  ;;  %1145 = vmatprep.subr.mxu1 %v117_v34 }
  0x23   :  { %1183 = vmatpush3.msra.mxu0 %v207_v33  ;;  %1146 = vmatpush3.msra.mxu1 %v117_v34 }
  0x24   :  { %1147 = vmatprep.subr.mxu1 %v116_v35  ;;  %1243 = vset.pattern.permute.xlu0 %v1304_v36 }
  0x25   :  { %1148 = vmatpush3.msra.mxu1 %v116_v35  ;;  %1244 = vset.pattern.permute.xlu1 %v1305_v37 }
  0xc6   :  { %v1469_v38 = vpop.f32.mrf.mxu1 }
  0xc7   :  { %1194 = vmatprep.subr.mxu0 %v1469_v38 }
  0xc8   :  { %v1472_v39 = vpop.f32.mrf.mxu1 }
  0xc9   :  { %1149 = vmatprep.mubr.f32.mxu1 %v1472_v39  ;;  %1184 = vmatprep.mubr.f32.mxu0 %v1472_v39 }
  0xca   :  { %1150 = vmatmul.mubr.f32.vlgmr.msra.gmra.mxu1 %v1469_v38  ;;  %1185 = vmatmul.mubr.f32.vlgmr.msra.gmra.mxu0 %v1469_v38 }
  0xcb   :  { %1195 = vmatpush3.msra.mxu0 %v1469_v38 }
  0xcc   :  { %1196 = vmatprep.subr.mxu0 %v1472_v39 }
  0xcd   :  { %1197 = vmatpush3.msra.mxu0 %v1472_v39 }
 0x18a   :  { %v1151_v40 = vpop.f32.mrf.mxu1  ;;  %v1186_v44 = vpop.f32.mrf.mxu0 }
 0x18b   :  { %339 = vperm.xlu1 %1244, %v1151_v40   ;;  %383 = vperm.xlu0 %1243, %v1151_v40  }
 0x18c   :  { %v198_v41 = vpop.f32.mrf.mxu1  ;;  %v289_v45 = vpop.f32.mrf.mxu0 }
 0x18f   :  { %1245 = vset.pattern.permute.xlu1 %v1306_v42  ;;  %379 = vperm.xlu0 %1243, %v198_v41  }
 0x190   :  { %597 = vperm.xlu1 %1245, %v1151_v40  }
 0x193   :  { %1247 = vset.pattern.permute.xlu0 %v1306_v42 }
 0x194   :  { %1246 = vset.pattern.permute.xlu1 %v1305_v37  ;;  %593 = vperm.xlu0 %1247, %v198_v41  }
 0x195   :  { %334 = vperm.xlu1 %1246, %v198_v41  }
 0x198   :  { %1248 = vset.pattern.permute.xlu0 %v1307_v43 }
 0x199   :  { %1249 = vset.pattern.permute.xlu1 %v1307_v43  ;;  %730 = vperm.xlu0 %1248, %v1151_v40  }
 0x19a   :  { %726 = vperm.xlu1 %1249, %v198_v41  }
 0x1c3   :  { %298 = vxpose.xlu1.b32.start [1/2] (short) (narrow) %v289_v45, 8 }
 0x1c7   :  { %299 = vxpose.xlu1.b32.end [2/2] (short) (narrow) %v1186_v44, 8 }
 0x206   :  { %v340_v46 = vpop.permute.xlu1 %339  ;;  %v384_v51 = vpop.permute.xlu0 %383 }
 0x20a   :  { %v380_v60 = vpop.permute.xlu0 %379 }
 0x20b   :  { %v598_v47 = vpop.permute.xlu1 %597 }
 0x20f   :  { %v594_v13 = vpop.permute.xlu0 %593 }
 0x210   :  { %v335_v49 = vpop.permute.xlu1 %334 }
 0x214   :  { %v731_v27 = vpop.permute.xlu0 %730 }
 0x215   :  { %v727_v52 = vpop.permute.xlu1 %726 }
 0x23f   :  { %v314_v56 = vpop.trf.xlu1 }
 0x240   :  { %v345_v57 = vrot.slane %v314_v56, %v344_v53  ;;  %v389_v58 = vrot.slane %v314_v56, %v388_v54  ;;  %v603_v59 = vrot.slane %v314_v56, %v602_v55  ;;  %v736_v18 = vrot.slane %v314_v56, %v735_v4 }
 0x242   :  { %v347_v61 = vadd.f32 %v345_v57, %v340_v46  ;;  %v390_v62 = vadd.f32 %v389_v58, %v380_v60  ;;  %v391_v63 = vadd.f32 %v389_v58, %v384_v51  ;;  %v605_v0 = vadd.f32 %v603_v59, %v598_v47 }
 0x243   :  { %v346_v6 = vadd.f32 %v345_v57, %v335_v49  ;;  %v604_v17 = vadd.f32 %v603_v59, %v594_v13  ;;  %v737_v24 = vadd.f32 %v736_v18, %v727_v52  ;;  %v738_v30 = vadd.f32 %v736_v18, %v731_v27 }
 0x244   :  { %vm349_vm1 = vcmp.ge.f32.partialorder %v347_v61, 0.0  ;;  %v351_v2 = vmul.f32 0.2, %v347_v61  ;;  %vm393_vm2 = vcmp.ge.f32.partialorder %v391_v63, 0.0  ;;  %v395_v3 = vmul.f32 0.2, %v391_v63 }
 0x245   :  { %vm607_vm3 = vcmp.ge.f32.partialorder %v605_v0, 0.0  ;;  %v609_v5 = vmul.f32 0.2, %v605_v0  ;;  %v394_v9 = vmul.f32 0.2, %v390_v62  ;;  %vm392_vm4 = vcmp.ge.f32.partialorder %v390_v62, 0.0 }
 0x246   :  { %v353_v7 = vsel %vm349_vm1, %v347_v61, %v351_v2  ;;  %v397_v8 = vsel %vm393_vm2, %v391_v63, %v395_v3  ;;  %v350_v21 = vmul.f32 0.2, %v346_v6  ;;  %vm348_vm5 = vcmp.ge.f32.partialorder %v346_v6, 0.0 }
 0x247   :  { %v355_v10 = vadd.f32 %v353_v7, %v331_v1  ;;  %v399_v11 = vadd.f32 %v397_v8, %v331_v1  ;;  %v611_v12 = vsel %vm607_vm3, %v605_v0, %v609_v5  ;;  %v396_v20 = vsel %vm392_vm4, %v390_v62, %v394_v9 }
 0x248   :  { %v613_v16 = vadd.f32 %v611_v12, %v331_v1  ;;  %v1490_v23 = vadd.f32 %v396_v20, %v330_v19  ;;  %v352_v25 = vsel %vm348_vm5, %v346_v6, %v350_v21  ;;  %v608_v26 = vmul.f32 0.2, %v604_v17 }
 0x249   :  { %v359_v14 = vsel %vm34_vm0, %v355_v10, -inf  ;;  %v403_v15 = vsel %vm34_vm0, %v399_v11, -inf  ;;  %vm606_vm6 = vcmp.ge.f32.partialorder %v604_v17, 0.0  ;;  %v1494_v29 = vadd.f32 %v352_v25, %v330_v19 }
 0x24a   :  { %360 = vmax.xlane.f32.xlu1 %v359_v14  ;;  %404 = vmax.xlane.f32.xlu0 %v403_v15  ;;  %v617_v22 = vsel %vm34_vm0, %v613_v16, -inf  ;;  %v400_v28 = vsel %vm34_vm0, %v1490_v23, -inf  ;;  %v610_v31 = vsel %vm606_vm6, %v604_v17, %v608_v26  ;;  %v741_v32 = vmul.f32 0.2, %v737_v24 }
 0x24b   :  { %vm739_vm7 = vcmp.ge.f32.partialorder %v737_v24, 0.0  ;;  %v356_v33 = vsel %vm34_vm0, %v1494_v29, -inf  ;;  %v1498_v34 = vadd.f32 %v610_v31, %v330_v19  ;;  %v742_v36 = vmul.f32 0.2, %v738_v30 }
 0x24c   :  { %v743_v35 = vsel %vm739_vm7, %v737_v24, %v741_v32  ;;  %vm740_vm8 = vcmp.ge.f32.partialorder %v738_v30, 0.0 }
 0x24d   :  { %v614_v37 = vsel %vm34_vm0, %v1498_v34, -inf  ;;  %v745_v40 = vadd.f32 %v743_v35, %v330_v19  ;;  %v744_v41 = vsel %vm740_vm8, %v738_v30, %v742_v36 }
 0x24e   :  { %618 = vmax.xlane.f32.xlu0 %v617_v22  ;;  %v746_v43 = vadd.f32 %v744_v41, %v331_v1 }
 0x24f   :  { %v747_v42 = vsel %vm34_vm0, %v745_v40, -inf }
 0x250   :  { %v750_v44 = vsel %vm34_vm0, %v746_v43, -inf }
 0x252   :  { %401 = vmax.xlane.f32.xlu0 %v400_v28 }
 0x256   :  { %357 = vmax.xlane.f32.xlu0 %v356_v33 }
 0x25a   :  { %615 = vmax.xlane.f32.xlu0 %v614_v37 }
 0x25b   :  { %426 = vrot.lane.b32.xlu1 %v1469_v38, %s1308_s4 }
 0x25e   :  { %748 = vmax.xlane.f32.xlu0 %v747_v42 }
 0x25f   :  { %638 = vrot.lane.b32.xlu1 %v1469_v38, %s1309_s29 }
 0x262   :  { %751 = vmax.xlane.f32.xlu0 %v750_v44 }
 0x263   :  { %636 = vrot.lane.b32.xlu1 %v1472_v39, %s1309_s29 }
 0x278   :  { %424 = vrot.lane.b32.xlu0 %v1472_v39, %s1308_s4 }
 0x2d3   :  { %v361_v45 = vpop.xlane.xlu1 %360  ;;  %v405_v46 = vpop.xlane.xlu0 %404 }
 0x2d4   :  { %v363_v47 = vsub.f32 %v355_v10, %v361_v45  ;;  %v407_v48 = vsub.f32 %v399_v11, %v405_v46 }
 0x2d6   :  { %v410_v49 = vmul.f32 1.442695, %v407_v48  ;;  %v366_v50 = vmul.f32 1.442695, %v363_v47 }
 0x2d7   :  { %v427_v51 = vpop.permute.xlu1 %426  ;;  %v619_v52 = vpop.xlane.xlu0 %618 }
 0x2d8   :  { %v621_v53 = vsub.f32 %v613_v16, %v619_v52  ;;  %1187 = vmatprep.subr.mxu1 %v427_v51  ;;  %1250 = vpow2.f32 %v410_v49  ;;  %v935_v52 = vld [vmem:[%s1569_s6 + $0x18] sm:$0xff] }
 0x2d9   :  { %1188 = vmatpush3.msra.mxu1 %v427_v51  ;;  %1252 = vpow2.f32 %v366_v50  ;;  %v1311_v51 = vmov 0.0  }
 0x2da   :  { %v624_v54 = vmul.f32 1.442695, %v621_v53  ;;  %v934_v53 = vld [vmem:[%s1569_s6 + $0x10] sm:$0xff] }
 0x2db   :  { %v402_v55 = vpop.xlane.xlu0 %401  ;;  %v639_v10 = vpop.permute.xlu1 %638 }
 0x2dc   :  { %1254 = vpow2.f32 %v624_v54  ;;  %v406_v63 = vsub.f32 %v1490_v23, %v402_v55  ;;  %v933_v54 = vld [vmem:[%s1569_s6 + $0x8] sm:$0xff] }
 0x2de   :  { %v408_v5 = vmul.f32 1.442695, %v406_v63 }
 0x2df   :  { %v358_v56 = vpop.xlane.xlu0 %357  ;;  %v637_v28 = vpop.permute.xlu1 %636 }
 0x2e0   :  { %v362_v6 = vsub.f32 %v1494_v29, %v358_v56 }
 0x2e2   :  { %v364_v11 = vmul.f32 1.442695, %v362_v6  ;;  %v932_v6 = vld [vmem:[%s1569_s6] sm:$0xff] }
 0x2e3   :  { %v616_v57 = vpop.xlane.xlu0 %615 }
 0x2e4   :  { %v620_v12 = vsub.f32 %v1498_v34, %v616_v57 }
 0x2e5   :  { %v1508_v58 = vpop.eup %1250 }
 0x2e6   :  { %v415_v59 = vsel %vm34_vm0, %v1508_v58, 0.0  ;;  %v1512_v61 = vpop.eup %1252  ;;  %v622_v13 = vmul.f32 1.442695, %v620_v12 }
 0x2e7   :  { %v749_v60 = vpop.xlane.xlu0 %748  ;;  %416 = vadd.xlane.f32.xlu0 %v415_v59  ;;  %v371_v1 = vsel %vm34_vm0, %v1512_v61, 0.0 }
 0x2e8   :  { %v753_v62 = vsub.f32 %v745_v40, %v749_v60 }
 0x2e9   :  { %v1517_v3 = vpop.eup %1254 }
 0x2ea   :  { %v755_v0 = vmul.f32 1.442695, %v753_v62  ;;  %v629_v8 = vsel %vm34_vm0, %v1517_v3, 0.0 }
 0x2eb   :  { %v752_v2 = vpop.xlane.xlu0 %751  ;;  %372 = vadd.xlane.f32.xlu0 %v371_v1 }
 0x2ec   :  { %1256 = vpow2.f32 %v755_v0  ;;  %v754_v4 = vsub.f32 %v746_v43, %v752_v2 }
 0x2ee   :  { %v757_v7 = vmul.f32 1.442695, %v754_v4 }
 0x2ef   :  { %v425_v9 = vpop.permute.xlu0 %424  ;;  %630 = vadd.xlane.f32.xlu0 %v629_v8 }
 0x2f0   :  { %1258 = vpow2.f32 %v757_v7  ;;  %1189 = vmatprep.subr.mxu1 %v425_v9 }
 0x2f1   :  { %1190 = vmatpush3.msra.mxu1 %v425_v9  ;;  %1260 = vpow2.f32 %v408_v5  ;;  %v858_v5 = vld [vmem:[%s1568_s5] sm:$0x3]  ;;  %s1282_s5 = scalar_lea.vmem %s1026_s21, 32 }
 0x2f2   :  { %1201 = vmatprep.subr.mxu1 %v639_v10  ;;  %1262 = vpow2.f32 %v364_v11  ;;  %v1044_v9 = vld [vmem:[%s1570_s7] ss:$0 sm:$0xff]  ;;  %p1283_p0 = scmp.ne.s32.totalorder %s1026_s21, %s1282_s5  ;;  %p1288_p2 = scmp.lt.s32.totalorder %s1282_s5, %s1282_s5 }
 0x2f3   :  { %1264 = vpow2.f32 %v622_v13 }
 0x2f4   :  { %p1289_p3 = por %p1288_p2, %p1287_p1 }
 0x2f6   :  { %p1290_p4 = pnand %p1289_p3, %p1283_p0 }
 0x2f9   :  { %v1257_v14 = vpop.eup %1256 }
 0x2fa   :  { %v759_v15 = vsel %vm34_vm0, %v1257_v14, 0.0 }
 0x2fb   :  { %760 = vadd.xlane.f32.xlu1 %v759_v15 }
 0x2fd   :  { %v1259_v16 = vpop.eup %1258 }
 0x2fe   :  { %v762_v17 = vsel %vm34_vm0, %v1259_v16, 0.0  ;;  %v1261_v18 = vpop.eup %1260 }
 0x2ff   :  { %763 = vadd.xlane.f32.xlu0 %v762_v17  ;;  %v412_v19 = vsel %vm34_vm0, %v1261_v18, 0.0  ;;  %v1263_v20 = vpop.eup %1262 }
 0x300   :  { %v368_v21 = vsel %vm34_vm0, %v1263_v20, 0.0  ;;  %v1265_v22 = vpop.eup %1264 }
 0x301   :  { %v626_v23 = vsel %vm34_vm0, %v1265_v22, 0.0 }
 0x303   :  { %413 = vadd.xlane.f32.xlu0 %v412_v19 }
 0x307   :  { %369 = vadd.xlane.f32.xlu0 %v368_v21 }
 0x30b   :  { %627 = vadd.xlane.f32.xlu0 %v626_v23 }
 0x30c   :  { %769 = vrot.lane.b32.xlu1 %v1472_v39, %s1310_s30 }
 0x321   :  { %771 = vrot.lane.b32.xlu0 %v1469_v38, %s1310_s30 }
 0x370   :  { %v417_v24 = vpop.xlane.xlu0 %416 }
 0x371   :  { %1266 = vrcp.f32 %v417_v24 }
 0x374   :  { %v373_v25 = vpop.xlane.xlu0 %372 }
 0x378   :  { %v631_v26 = vpop.xlane.xlu0 %630 }
 0x37e   :  { %v1267_v33 = vpop.eup %1266 }
 0x37f   :  { %v421_v36 = vmul.f32 %v1267_v33, %v1508_v58 }
 0x384   :  { %v761_v30 = vpop.xlane.xlu1 %760 }
 0x388   :  { %v764_v27 = vpop.xlane.xlu0 %763  ;;  %v770_v47 = vpop.permute.xlu1 %769 }
 0x38c   :  { %v414_v29 = vpop.xlane.xlu0 %413 }
 0x38d   :  { %1268 = vrcp.f32 %v414_v29 }
 0x38e   :  { %1270 = vrcp.f32 %v373_v25 }
 0x38f   :  { %1272 = vrcp.f32 %v761_v30 }
 0x390   :  { %v370_v31 = vpop.xlane.xlu0 %369 }
 0x391   :  { %1274 = vrcp.f32 %v370_v31 }
 0x392   :  { %1276 = vrcp.f32 %v631_v26 }
 0x393   :  { %1278 = vrcp.f32 %v764_v27 }
 0x394   :  { %v628_v32 = vpop.xlane.xlu0 %627 }
 0x395   :  { %1280 = vrcp.f32 %v628_v32 }
 0x398   :  { %v772_v39 = vpop.permute.xlu0 %771 }
 0x399   :  { %1208 = vmatprep.subr.mxu0 %v772_v39 }
 0x39a   :  { %v1269_v38 = vpop.eup %1268 }
 0x39b   :  { %v420_v34 = vmul.f32 %v1269_v38, %v1261_v18  ;;  %v1271_v35 = vpop.eup %1270 }
 0x39c   :  { %v1273_v37 = vpop.eup %1272  ;;  %v377_v43 = vmul.f32 %v1271_v35, %v1512_v61 }
 0x39d   :  { %1191 = vmatprep.mubr.msk.f32.mxu1 %vm34_vm0, %v420_v34  ;;  %v767_v45 = vmul.f32 %v1273_v37, %v1257_v14 }
 0x39e   :  { %v1275_v40 = vpop.eup %1274  ;;  %1192 = vmatmul.mubr.msk.f32.vlgmr.msra.gmra.mxu1 %vm34_vm0, %v421_v36 }
 0x39f   :  { %1202 = vmatpush3.msra.mxu1 %v639_v10  ;;  %v376_v41 = vmul.f32 %v1275_v40, %v1263_v20  ;;  %v1277_v42 = vpop.eup %1276 }
 0x3a0   :  { %1203 = vmatprep.subr.mxu1 %v637_v28  ;;  %v1279_v44 = vpop.eup %1278  ;;  %v635_v49 = vmul.f32 %v1277_v42, %v1517_v3 }
 0x3a1   :  { %1204 = vmatpush3.msra.mxu1 %v637_v28  ;;  %1198 = vmatprep.mubr.msk.f32.mxu0 %vm34_vm0, %v376_v41  ;;  %v768_v50 = vmul.f32 %v1279_v44, %v1259_v16 }
 0x3a2   :  { %v1281_v46 = vpop.eup %1280  ;;  %1199 = vmatmul.mubr.msk.f32.vlgmr.msra.gmra.mxu0 %vm34_vm0, %v377_v43  ;;  %1215 = vmatprep.subr.mxu1 %v1311_v51 }
 0x3a3   :  { %1209 = vmatpush3.msra.mxu0 %v772_v39  ;;  %1212 = vmatprep.mubr.msk.f32.mxu0 %vm34_vm0, %v767_v45  ;;  %v634_v48 = vmul.f32 %v1281_v46, %v1265_v22 }
 0x3a4   :  { %1210 = vmatprep.subr.mxu0 %v770_v47 }
 0x3a5   :  { %1211 = vmatpush3.msra.mxu0 %v770_v47  ;;  %1205 = vmatprep.mubr.msk.f32.mxu1 %vm34_vm0, %v634_v48 }
 0x3a6   :  { %1206 = vmatmul.mubr.msk.f32.vlgmr.msra.gmra.mxu1 %vm34_vm0, %v635_v49  ;;  %1213 = vmatmul.mubr.msk.f32.vlgmr.msra.gmra.mxu0 %vm34_vm0, %v768_v50 }
 0x3a7   :  { %1222 = vmatprep.subr.mxu0 %v1311_v51  ;;  %1219 = vmatprep.mubr.msk.f32.mxu1 %vm1312_vm9, %v1311_v51 }
 0x3a8   :  { %1230 = vmatprep.mubr.msk.f32.mxu0 %vm1312_vm9, %v1311_v51  ;;  %1223 = vmatpush3.msra.mxu0 %v935_v52 }
 0x3a9   :  { %1224 = vmatprep.subr.mxu0 %v1311_v51 }
 0x3aa   :  { %1225 = vmatpush3.msra.mxu0 %v934_v53 }
 0x3ab   :  { %1226 = vmatprep.subr.mxu0 %v1311_v51 }
 0x3ac   :  { %1227 = vmatpush3.msra.mxu0 %v933_v54 }
 0x3ad   :  { %1228 = vmatprep.subr.mxu0 %v1311_v51 }
 0x3ae   :  { %1229 = vmatpush3.msra.mxu0 %v932_v6 }
 0x45e   :  { %v1193_v55 = vpop.f32.mrf.mxu1 }
 0x460   :  { %v502_v57 = vpop.f32.mrf.mxu1 }
 0x462   :  { %v1200_v56 = vpop.f32.mrf.mxu0 }
 0x463   :  { %v589_v59 = vadd.f32 %v1200_v56, %v1193_v55 }
 0x464   :  { %v583_v58 = vpop.f32.mrf.mxu0 }
 0x465   :  { %v584_v62 = vadd.f32 %v583_v58, %v502_v57 }
 0x466   :  { %v1207_v60 = vpop.f32.mrf.mxu1  ;;  %v1214_v61 = vpop.f32.mrf.mxu0 }
 0x467   :  { %v724_v63 = vadd.f32 %v1207_v60, %v589_v59 }
 0x468   :  { %v714_v0 = vpop.f32.mrf.mxu1  ;;  %v847_v3 = vpop.f32.mrf.mxu0 }
 0x469   :  { %v857_v1 = vadd.f32 %v1214_v61, %v724_v63  ;;  %v723_v2 = vadd.f32 %v714_v0, %v584_v62 }
 0x46b   :  { %v856_v4 = vadd.f32 %v847_v3, %v723_v2  ;;  %1216 = vmatpush3.msra.mxu1 %v857_v1 }
 0x46c   :  { %1217 = vmatprep.subr.mxu1 %v1311_v51 }
 0x46d   :  { %1218 = vmatpush3.msra.mxu1 %v856_v4 }
 0x46e   :  { %1220 = vmatmul.mubr.msk.f32.vlgmr.msra.gmra.mxu1 %vm34_vm0, %v858_v5 }
 0x52e   :  { %v928_v7 = vpop.f32.mrf.mxu1 }
 0x52f   :  { %1231 = vmatmul.mubr.msk.f32.vlgmr.msra.gmra.mxu0 %vm943_vm10, %v928_v7 }
 0x530   :  { %v1221_v8 = vpop.f32.mrf.mxu1 }
 0x5ef   :  { %v1013_v10 = vpop.f32.mrf.mxu0 }
 0x5f0   :  { %v1014_v11 = vadd.f32 %v1044_v9, %v1013_v10 }
 0x5f1   :  { %v1232_v12 = vpop.f32.mrf.mxu0 }
 0x5f2   :  { %1018 = vst.msk [vmem:[#allocation2] sm:$0x3] %vm1017_vm11, %v1014_v11 }
 0x5f3   :  { %1293 = shalt.err (!%p1290_p4)
}
 0x5f4   :  { %1028 = dma.vmem_to_hbm [thread:$0]  %s1026_s21, 32, %s1571_s8, [#allocation3]  }
 0x5f5   :  { %1302 = dma.done.wait [#allocation3], 32  }
 0x5f6   :  { %1303 = vsyncadd [#allocation3], 4294967264 }
 0x5f7   :  { %1032 = vsyncpa [#allocation3], 1 }

</bundles_post_ra>
